<compile_context>
chip_gen: v7x
topology: tpu7x:2x2x1
jax: 0.10.0
libtpu: 0.0.40
codegen_flags: <defaults>
</compile_context>

<pallas_src>
import math
import functools

import numpy as np
import jax
import jax.numpy as jnp
from jax import lax
from jax.experimental import pallas as pl
from jax.experimental.pallas import tpu as pltpu


def decoder_block_kernel(
    xq_ref, xk_ref,
    wq_ref, wk_ref, wv_ref, bq_ref, bk_ref, bv_ref,
    wo_ref, bo_ref, w1_ref, b1_ref, w2_ref, b2_ref,
    g1_ref, beta1_ref, g2_ref, beta2_ref,
    out_ref,
    q_sc, m_sc, l_sc, acc_sc,
    *, num_heads):
  """Grid = (batch, q-tile, kv-tile). Online-softmax attention + fused epilogue."""
  H = num_heads
  tq = xq_ref.shape[1]
  D = xq_ref.shape[2]
  hd = D // H

  kj = pl.program_id(2)
  nk = pl.num_programs(2)

  # ---- first K/V tile of this (batch, q-tile): project Q once, reset softmax state ----
  @pl.when(kj == 0)
  def _init():
    xq_bf = xq_ref[0].astype(jnp.bfloat16)                      # (tq, D)
    m_sc[...] = jnp.full_like(m_sc, -jnp.inf)
    l_sc[...] = jnp.zeros_like(l_sc)
    acc_sc[...] = jnp.zeros_like(acc_sc)

    def q_body(h, carry):
      # 1/sqrt(hd) softmax scale is already folded into wq/bq on the host.
      q_h = jnp.dot(xq_bf, wq_ref[h],
                    preferred_element_type=jnp.float32) + bq_ref[h]   # (tq, hd)
      q_sc[h] = q_h.astype(jnp.bfloat16)
      return carry
    lax.fori_loop(0, H, q_body, 0)

  # ---- one K/V tile: per-head K/V projection + online-softmax update ----
  xk_bf = xk_ref[0].astype(jnp.bfloat16)                        # (tk, D), hoisted
  dn_qkT = (((1,), (1,)), ((), ()))                             # q @ k^T (contract hd)

  def head_body(h, carry):
    k_h = (jnp.dot(xk_bf, wk_ref[h], preferred_element_type=jnp.float32)
           + bk_ref[h]).astype(jnp.bfloat16)                    # (tk, hd)
    v_h = (jnp.dot(xk_bf, wv_ref[h], preferred_element_type=jnp.float32)
           + bv_ref[h]).astype(jnp.bfloat16)                    # (tk, hd)
    s = lax.dot_general(q_sc[h], k_h, dn_qkT,
                        preferred_element_type=jnp.float32)      # (tq, tk)
    m_prev = m_sc[h]
    m_new = jnp.maximum(m_prev, jnp.max(s, axis=-1, keepdims=True))
    alpha = jnp.exp(m_prev - m_new)
    p = jnp.exp(s - m_new)
    l_sc[h] = alpha * l_sc[h] + jnp.sum(p, axis=-1, keepdims=True)
    acc_sc[h] = alpha * acc_sc[h] + jnp.dot(
        p.astype(jnp.bfloat16), v_h, preferred_element_type=jnp.float32)
    m_sc[h] = m_new
    return carry
  lax.fori_loop(0, H, head_body, 0)

  # ---- last K/V tile: O-projection, residual+LN1, FFN, residual+LN2 ----
  @pl.when(kj == nk - 1)
  def _finalize():
    def o_body(h, acc_o):
      vals_h = acc_sc[h] * pl.reciprocal(l_sc[h], approx=True)  # (tq, hd) f32
      return acc_o + jnp.dot(vals_h.astype(jnp.bfloat16), wo_ref[h],
                             preferred_element_type=jnp.float32)
    attn = lax.fori_loop(0, H, o_body, jnp.zeros((tq, D), jnp.float32))
    attn = attn + bo_ref[...]

    x1 = xq_ref[0] + attn                                       # residual (f32)
    mu1 = jnp.mean(x1, axis=-1, keepdims=True)
    var1 = jnp.mean((x1 - mu1) ** 2, axis=-1, keepdims=True)
    x1n = (x1 - mu1) * lax.rsqrt(var1 + 1e-5) * g1_ref[...] + beta1_ref[...]

    h1 = jnp.dot(x1n.astype(jnp.bfloat16), w1_ref[...],
                 preferred_element_type=jnp.float32) + b1_ref[...]
    h1 = jnp.maximum(h1, 0.0)
    ff = jnp.dot(h1.astype(jnp.bfloat16), w2_ref[...],
                 preferred_element_type=jnp.float32) + b2_ref[...]

    x2 = x1n + ff
    mu2 = jnp.mean(x2, axis=-1, keepdims=True)
    var2 = jnp.mean((x2 - mu2) ** 2, axis=-1, keepdims=True)
    out = (x2 - mu2) * lax.rsqrt(var2 + 1e-5) * g2_ref[...] + beta2_ref[...]
    out_ref[0] = out.astype(out_ref.dtype)


def _round_up(n, m):
  return (n + m - 1) // m * m


def _padded_bytes(shape, itemsize):
  """VMEM footprint of an array with (8,128) tile padding on the last two dims."""
  if len(shape) == 1:
    return _round_up(shape[0] * itemsize, 4 * 128)
  lead = 1
  for d in shape[:-2]:
    lead *= d
  return lead * _round_up(shape[-2], 8) * _round_up(shape[-1], 128) * itemsize


def _vmem_limit_bytes(D, F, H, tq, tk):
  hd = D // H
  blocks = (
      _padded_bytes((tq, D), 4) + _padded_bytes((tk, D), 4)               # x tiles
      + 3 * _padded_bytes((H, D, hd), 2) + _padded_bytes((H, hd, D), 2)   # attn weights (bf16)
      + 3 * _padded_bytes((H, 1, hd), 4)
      + _padded_bytes((D, F), 2) + _padded_bytes((F, D), 2)               # FFN weights (bf16)
      + _padded_bytes((1, F), 4) + 6 * _padded_bytes((1, D), 4))
  scratch = (_padded_bytes((H, tq, hd), 4) + _padded_bytes((H, tq, hd), 2)
             + 2 * _padded_bytes((H, tq, 1), 4))
  interm = (4 * _padded_bytes((tq, tk), 4) + _padded_bytes((tq, F), 4)
            + 8 * _padded_bytes((tq, D), 4) + 2 * _padded_bytes((tk, D), 4))
  est = 2 * blocks + scratch + interm                                     # 2x: double buffering
  return int(min(max(est, 32 * 1024 * 1024), 64 * 1024 * 1024))           # cap at v7x physical


def _pick_tile(s):
  for t in (256, 128):
    if s >= t and s % t == 0:
      return t
  return s


def decoder_block(x, params, num_heads):
  B, S, D = x.shape
  H = num_heads
  assert D % H == 0, "embed_dim must be divisible by num_heads"
  hd = D // H
  F = params["w1"].shape[1]

  # ---- host-side parameter re-layout (one-time, XLA side) ----
  # PyTorch qkv_proj packs output features per head as [q_h | k_h | v_h]; split into
  # per-head weight stacks so the kernel only slices along the leading (head) axis.
  wqkv = params["wqkv"].reshape(D, H, 3, hd)
  scale = 1.0 / math.sqrt(hd)
  wq = (jnp.transpose(wqkv[:, :, 0, :], (1, 0, 2)) * scale).astype(jnp.bfloat16)  # (H,D,hd)
  wk = jnp.transpose(wqkv[:, :, 1, :], (1, 0, 2)).astype(jnp.bfloat16)
  wv = jnp.transpose(wqkv[:, :, 2, :], (1, 0, 2)).astype(jnp.bfloat16)
  bqkv = params["bqkv"].reshape(H, 3, hd)
  bq = (bqkv[:, 0, :] * scale)[:, None, :].astype(jnp.float32)                    # (H,1,hd)
  bk = bqkv[:, 1, :][:, None, :].astype(jnp.float32)
  bv = bqkv[:, 2, :][:, None, :].astype(jnp.float32)
  wo = params["wo"].reshape(H, hd, D).astype(jnp.bfloat16)                        # (H,hd,D)
  w1 = params["w1"].astype(jnp.bfloat16)
  w2 = params["w2"].astype(jnp.bfloat16)

  tq = _pick_tile(S)
  tk = _pick_tile(S)
  nq, nk = S // tq, S // tk

  def const_spec(shape):
    zeros = (0,) * len(shape)
    return pl.BlockSpec(shape, lambda b, i, j, _z=zeros: _z)

  in_specs = [
      pl.BlockSpec((1, tq, D), lambda b, i, j: (b, i, 0)),   # x (query rows)
      pl.BlockSpec((1, tk, D), lambda b, i, j: (b, j, 0)),   # x (key/value rows)
      const_spec((H, D, hd)),   # wq  (scale folded in)
      const_spec((H, D, hd)),   # wk
      const_spec((H, D, hd)),   # wv
      const_spec((H, 1, hd)),   # bq
      const_spec((H, 1, hd)),   # bk
      const_spec((H, 1, hd)),   # bv
      const_spec((H, hd, D)),   # wo
      const_spec((1, D)),       # bo
      const_spec((D, F)),       # w1
      const_spec((1, F)),       # b1
      const_spec((F, D)),       # w2
      const_spec((1, D)),       # b2
      const_spec((1, D)),       # ln1 gamma
      const_spec((1, D)),       # ln1 beta
      const_spec((1, D)),       # ln2 gamma
      const_spec((1, D)),       # ln2 beta
  ]

  scratch_shapes = [
      pltpu.VMEM((H, tq, hd), jnp.bfloat16),   # q (per head)
      pltpu.VMEM((H, tq, 1), jnp.float32),     # running max
      pltpu.VMEM((H, tq, 1), jnp.float32),     # running denom
      pltpu.VMEM((H, tq, hd), jnp.float32),    # running numerator
  ]

  kernel = functools.partial(decoder_block_kernel, num_heads=H)

  return pl.pallas_call(
      kernel,
      out_shape=jax.ShapeDtypeStruct((B, S, D), x.dtype),
      grid_spec=pltpu.PrefetchScalarGridSpec(
          num_scalar_prefetch=0,
          grid=(B, nq, nk),
          in_specs=in_specs,
          out_specs=pl.BlockSpec((1, tq, D), lambda b, i, j: (b, i, 0)),
          scratch_shapes=scratch_shapes),
      compiler_params=pltpu.CompilerParams(
          dimension_semantics=("parallel", "parallel", "arbitrary"),
          vmem_limit_bytes=_vmem_limit_bytes(D, F, H, tq, tk)),
  )(x, x, wq, wk, wv, bq, bk, bv, wo,
    params["bo"], w1, params["b1"], w2, params["b2"],
    params["g1"], params["beta1"], params["g2"], params["beta2"])


def reference_decoder_block(x, params, num_heads):
  """Pure-JAX f32 reference mirroring the PyTorch forward (for a correctness check)."""
  B, S, D = x.shape
  hd = D // num_heads
  qkv = x @ params["wqkv"] + params["bqkv"]                    # (B,S,3D)
  qkv = qkv.reshape(B, S, num_heads, 3 * hd).transpose(0, 2, 1, 3)
  q, k, v = jnp.split(qkv, 3, axis=-1)
  logits = jnp.einsum("bhqd,bhkd->bhqk", q, k) / math.sqrt(hd)
  attn = jax.nn.softmax(logits, axis=-1)
  vals = jnp.einsum("bhqk,bhkd->bhqd", attn, v)
  vals = vals.transpose(0, 2, 1, 3).reshape(B, S, D)
  o = vals @ params["wo"] + params["bo"]

  def ln(t, g, b):
    mu = jnp.mean(t, axis=-1, keepdims=True)
    var = jnp.mean((t - mu) ** 2, axis=-1, keepdims=True)
    return (t - mu) * jax.lax.rsqrt(var + 1e-5) * g + b

  x1 = ln(x + o, params["g1"], params["beta1"])
  ff = jnp.maximum(x1 @ params["w1"] + params["b1"], 0.0) @ params["w2"] + params["b2"]
  return ln(x1 + ff, params["g2"], params["beta2"])


def xavier(key, shape):
  fan_in, fan_out = shape[0], shape[1]
  bound = math.sqrt(6.0 / (fan_in + fan_out))
  return jax.random.uniform(key, shape, jnp.float32, -bound, bound)


if __name__ == "__main__":
  B, S, D, H, F = 2, 8, 32, 4, 64   # batch, seq, embed, heads, ffn hidden

  key = jax.random.PRNGKey(0)
  keys = jax.random.split(key, 8)

  params = {
      # attention (xavier-uniform weights, zero biases, matching _reset_parameters)
      "wqkv": xavier(keys[0], (D, 3 * D)),
      "bqkv": jnp.zeros((1, 3 * D), jnp.float32),
      "wo": xavier(keys[1], (D, D)),
      "bo": jnp.zeros((1, D), jnp.float32),
      # MLP
      "w1": xavier(keys[2], (D, F)),
      "b1": 0.01 * jax.random.normal(keys[3], (1, F), jnp.float32),
      "w2": xavier(keys[4], (F, D)),
      "b2": 0.01 * jax.random.normal(keys[5], (1, D), jnp.float32),
      # LayerNorms (PyTorch default init: weight=1, bias=0)
      "g1": jnp.ones((1, D), jnp.float32),
      "beta1": jnp.zeros((1, D), jnp.float32),
      "g2": jnp.ones((1, D), jnp.float32),
      "beta2": jnp.zeros((1, D), jnp.float32),
  }

  x = jax.random.normal(keys[6], (B, S, D), jnp.float32)

  out = decoder_block(x, params, num_heads=H)
  out = jax.block_until_ready(out)

  ref = jax.block_until_ready(reference_decoder_block(x, params, num_heads=H))
  # bf16 MXU inputs (f32 accumulation) -> looser tolerance than a pure-f32 kernel.
  np.testing.assert_allclose(np.asarray(out), np.asarray(ref), atol=5e-2, rtol=5e-2)

  print("KERNEL_OK")
</pallas_src>

<mosaic_0001>
module attributes {stable_mosaic.version = 11 : i64} {
  func.func @decoder_block_kernel(%arg0: i32, %arg1: i32, %arg2: i32, %arg3: memref<1x8x32xf32, #tpu.memory_space<vmem>>, %arg4: memref<1x8x32xf32, #tpu.memory_space<vmem>>, %arg5: memref<4x32x8xbf16, #tpu.memory_space<vmem>>, %arg6: memref<4x32x8xbf16, #tpu.memory_space<vmem>>, %arg7: memref<4x32x8xbf16, #tpu.memory_space<vmem>>, %arg8: memref<4x1x8xf32, #tpu.memory_space<vmem>>, %arg9: memref<4x1x8xf32, #tpu.memory_space<vmem>>, %arg10: memref<4x1x8xf32, #tpu.memory_space<vmem>>, %arg11: memref<4x8x32xbf16, #tpu.memory_space<vmem>>, %arg12: memref<1x32xf32, #tpu.memory_space<vmem>>, %arg13: memref<32x64xbf16, #tpu.memory_space<vmem>>, %arg14: memref<1x64xf32, #tpu.memory_space<vmem>>, %arg15: memref<64x32xbf16, #tpu.memory_space<vmem>>, %arg16: memref<1x32xf32, #tpu.memory_space<vmem>>, %arg17: memref<1x32xf32, #tpu.memory_space<vmem>>, %arg18: memref<1x32xf32, #tpu.memory_space<vmem>>, %arg19: memref<1x32xf32, #tpu.memory_space<vmem>>, %arg20: memref<1x32xf32, #tpu.memory_space<vmem>>, %arg21: memref<1x8x32xf32, #tpu.memory_space<vmem>>, %arg22: memref<4x8x8xbf16, #tpu.memory_space<vmem>>, %arg23: memref<4x8x1xf32, #tpu.memory_space<vmem>>, %arg24: memref<4x8x1xf32, #tpu.memory_space<vmem>>, %arg25: memref<4x8x8xf32, #tpu.memory_space<vmem>>) attributes {dimension_semantics = [#tpu.dimension_semantics<parallel>, #tpu.dimension_semantics<parallel>, #tpu.dimension_semantics<arbitrary>], iteration_bounds = array<i64: 2, 1, 1>, scalar_prefetch = 0 : i64, scratch_operands = 4 : i64, tpu.core_type = #tpu.core_type<tc>, window_params = [{transform_indices = @transform_0, window_bounds = array<i64: 1, 8, 32>}, {transform_indices = @transform_1, window_bounds = array<i64: 1, 8, 32>}, {pipeline_mode = #tpu.pipeline_mode<synchronous>, transform_indices = @transform_2, window_bounds = array<i64: 4, 32, 8>}, {pipeline_mode = #tpu.pipeline_mode<synchronous>, transform_indices = @transform_3, window_bounds = array<i64: 4, 32, 8>}, {pipeline_mode = #tpu.pipeline_mode<synchronous>, transform_indices = @transform_4, window_bounds = array<i64: 4, 32, 8>}, {pipeline_mode = #tpu.pipeline_mode<synchronous>, transform_indices = @transform_5, window_bounds = array<i64: 4, 1, 8>}, {pipeline_mode = #tpu.pipeline_mode<synchronous>, transform_indices = @transform_6, window_bounds = array<i64: 4, 1, 8>}, {pipeline_mode = #tpu.pipeline_mode<synchronous>, transform_indices = @transform_7, window_bounds = array<i64: 4, 1, 8>}, {pipeline_mode = #tpu.pipeline_mode<synchronous>, transform_indices = @transform_8, window_bounds = array<i64: 4, 8, 32>}, {pipeline_mode = #tpu.pipeline_mode<synchronous>, transform_indices = @transform_9, window_bounds = array<i64: 1, 32>}, {pipeline_mode = #tpu.pipeline_mode<synchronous>, transform_indices = @transform_10, window_bounds = array<i64: 32, 64>}, {pipeline_mode = #tpu.pipeline_mode<synchronous>, transform_indices = @transform_11, window_bounds = array<i64: 1, 64>}, {pipeline_mode = #tpu.pipeline_mode<synchronous>, transform_indices = @transform_12, window_bounds = array<i64: 64, 32>}, {pipeline_mode = #tpu.pipeline_mode<synchronous>, transform_indices = @transform_13, window_bounds = array<i64: 1, 32>}, {pipeline_mode = #tpu.pipeline_mode<synchronous>, transform_indices = @transform_14, window_bounds = array<i64: 1, 32>}, {pipeline_mode = #tpu.pipeline_mode<synchronous>, transform_indices = @transform_15, window_bounds = array<i64: 1, 32>}, {pipeline_mode = #tpu.pipeline_mode<synchronous>, transform_indices = @transform_16, window_bounds = array<i64: 1, 32>}, {pipeline_mode = #tpu.pipeline_mode<synchronous>, transform_indices = @transform_17, window_bounds = array<i64: 1, 32>}, {transform_indices = @transform_18, window_bounds = array<i64: 1, 8, 32>}]} {
    %c0_i32 = arith.constant 0 : i32
    %0 = arith.cmpi eq, %arg2, %c0_i32 : i32
    %1 = arith.extui %0 : i1 to i32
    %c0_i32_0 = arith.constant 0 : i32
    %2 = arith.cmpi ne, %1, %c0_i32_0 : i32
    scf.if %2 {
      %c0_7 = arith.constant 0 : index
      %c0_8 = arith.constant 0 : index
      %c0_9 = arith.constant 0 : index
      %10 = vector.load %arg3[%c0_7, %c0_8, %c0_9] : memref<1x8x32xf32, #tpu.memory_space<vmem>>, vector<1x8x32xf32>
      %11 = vector.shape_cast %10 : vector<1x8x32xf32> to vector<8x32xf32>
      %12 = arith.truncf %11 : vector<8x32xf32> to vector<8x32xbf16>
      %cst = arith.constant 0xFF800000 : f32
      %13 = vector.broadcast %cst : f32 to vector<4x8x1xf32>
      %c0_10 = arith.constant 0 : index
      %c0_11 = arith.constant 0 : index
      %c0_12 = arith.constant 0 : index
      %14 = vector.load %arg23[%c0_10, %c0_11, %c0_12] : memref<4x8x1xf32, #tpu.memory_space<vmem>>, vector<4x8x1xf32>
      tpu.vector_store %arg23[%c0_10, %c0_11, %c0_12], %13 {strides = array<i32>} : memref<4x8x1xf32, #tpu.memory_space<vmem>>, vector<4x8x1xf32>,
      %cst_13 = arith.constant 0.000000e+00 : f32
      %15 = vector.broadcast %cst_13 : f32 to vector<4x8x1xf32>
      %c0_14 = arith.constant 0 : index
      %c0_15 = arith.constant 0 : index
      %c0_16 = arith.constant 0 : index
      %16 = vector.load %arg24[%c0_14, %c0_15, %c0_16] : memref<4x8x1xf32, #tpu.memory_space<vmem>>, vector<4x8x1xf32>
      tpu.vector_store %arg24[%c0_14, %c0_15, %c0_16], %15 {strides = array<i32>} : memref<4x8x1xf32, #tpu.memory_space<vmem>>, vector<4x8x1xf32>,
      %cst_17 = arith.constant 0.000000e+00 : f32
      %17 = vector.broadcast %cst_17 : f32 to vector<4x8x8xf32>
      %c0_18 = arith.constant 0 : index
      %c0_19 = arith.constant 0 : index
      %c0_20 = arith.constant 0 : index
      %18 = vector.load %arg25[%c0_18, %c0_19, %c0_20] : memref<4x8x8xf32, #tpu.memory_space<vmem>>, vector<4x8x8xf32>
      tpu.vector_store %arg25[%c0_18, %c0_19, %c0_20], %17 {strides = array<i32>} : memref<4x8x8xf32, #tpu.memory_space<vmem>>, vector<4x8x8xf32>,
      %c0_i32_21 = arith.constant 0 : i32
      %c4_i32_22 = arith.constant 4 : i32
      %19 = arith.addi %c0_i32_21, %c4_i32_22 : i32
      %c1_i32_23 = arith.constant 1 : i32
      scf.for %arg26 = %c0_i32_21 to %19 step %c1_i32_23  : i32 {
        %20 = arith.index_cast %arg26 : i32 to index
        %c0_25 = arith.constant 0 : index
        %c0_26 = arith.constant 0 : index
        %21 = vector.load %arg5[%20, %c0_25, %c0_26] : memref<4x32x8xbf16, #tpu.memory_space<vmem>>, vector<1x32x8xbf16>
        %22 = vector.shape_cast %21 : vector<1x32x8xbf16> to vector<32x8xbf16>
        %cst_27 = arith.constant dense<0.000000e+00> : vector<8x8xf32>
        %23 = tpu.matmul %12, %22, %cst_27 {dimension_numbers = #tpu.dot_dimension_numbers<[1], [0], [0], [1], [0, 0, 1, 1], [], []>} : vector<8x32xbf16>, vector<32x8xbf16>, vector<8x8xf32> -> vector<8x8xf32>
        %24 = arith.index_cast %arg26 : i32 to index
        %c0_28 = arith.constant 0 : index
        %c0_29 = arith.constant 0 : index
        %25 = vector.load %arg8[%24, %c0_28, %c0_29] : memref<4x1x8xf32, #tpu.memory_space<vmem>>, vector<1x1x8xf32>
        %26 = vector.shape_cast %25 : vector<1x1x8xf32> to vector<1x8xf32>
        %27 = vector.broadcast %26 : vector<1x8xf32> to vector<8x8xf32>
        %28 = arith.addf %23, %27 : vector<8x8xf32>
        %29 = arith.truncf %28 : vector<8x8xf32> to vector<8x8xbf16>
        %30 = arith.index_cast %arg26 : i32 to index
        %c0_30 = arith.constant 0 : index
        %c0_31 = arith.constant 0 : index
        %31 = vector.load %arg22[%30, %c0_30, %c0_31] : memref<4x8x8xbf16, #tpu.memory_space<vmem>>, vector<1x8x8xbf16>
        %32 = vector.shape_cast %31 : vector<1x8x8xbf16> to vector<8x8xbf16>
        %33 = vector.shape_cast %29 : vector<8x8xbf16> to vector<1x8x8xbf16>
        tpu.vector_store %arg22[%30, %c0_30, %c0_31], %33 {strides = array<i32>} : memref<4x8x8xbf16, #tpu.memory_space<vmem>>, vector<1x8x8xbf16>,
      }
      %c4_i32_24 = arith.constant 4 : i32
    } else {
    }
    %c0 = arith.constant 0 : index
    %c0_1 = arith.constant 0 : index
    %c0_2 = arith.constant 0 : index
    %3 = vector.load %arg4[%c0, %c0_1, %c0_2] : memref<1x8x32xf32, #tpu.memory_space<vmem>>, vector<1x8x32xf32>
    %4 = vector.shape_cast %3 : vector<1x8x32xf32> to vector<8x32xf32>
    %5 = arith.truncf %4 : vector<8x32xf32> to vector<8x32xbf16>
    %c0_i32_3 = arith.constant 0 : i32
    %c4_i32 = arith.constant 4 : i32
    %6 = arith.addi %c0_i32_3, %c4_i32 : i32
    %c1_i32 = arith.constant 1 : i32
    scf.for %arg26 = %c0_i32_3 to %6 step %c1_i32  : i32 {
      %10 = arith.index_cast %arg26 : i32 to index
      %c0_7 = arith.constant 0 : index
      %c0_8 = arith.constant 0 : index
      %11 = vector.load %arg6[%10, %c0_7, %c0_8] : memref<4x32x8xbf16, #tpu.memory_space<vmem>>, vector<1x32x8xbf16>
      %12 = vector.shape_cast %11 : vector<1x32x8xbf16> to vector<32x8xbf16>
      %cst = arith.constant dense<0.000000e+00> : vector<8x8xf32>
      %13 = tpu.matmul %5, %12, %cst {dimension_numbers = #tpu.dot_dimension_numbers<[1], [0], [0], [1], [0, 0, 1, 1], [], []>} : vector<8x32xbf16>, vector<32x8xbf16>, vector<8x8xf32> -> vector<8x8xf32>
      %14 = arith.index_cast %arg26 : i32 to index
      %c0_9 = arith.constant 0 : index
      %c0_10 = arith.constant 0 : index
      %15 = vector.load %arg9[%14, %c0_9, %c0_10] : memref<4x1x8xf32, #tpu.memory_space<vmem>>, vector<1x1x8xf32>
      %16 = vector.shape_cast %15 : vector<1x1x8xf32> to vector<1x8xf32>
      %17 = vector.broadcast %16 : vector<1x8xf32> to vector<8x8xf32>
      %18 = arith.addf %13, %17 : vector<8x8xf32>
      %19 = arith.truncf %18 : vector<8x8xf32> to vector<8x8xbf16>
      %20 = arith.index_cast %arg26 : i32 to index
      %c0_11 = arith.constant 0 : index
      %c0_12 = arith.constant 0 : index
      %21 = vector.load %arg7[%20, %c0_11, %c0_12] : memref<4x32x8xbf16, #tpu.memory_space<vmem>>, vector<1x32x8xbf16>
      %22 = vector.shape_cast %21 : vector<1x32x8xbf16> to vector<32x8xbf16>
      %cst_13 = arith.constant dense<0.000000e+00> : vector<8x8xf32>
      %23 = tpu.matmul %5, %22, %cst_13 {dimension_numbers = #tpu.dot_dimension_numbers<[1], [0], [0], [1], [0, 0, 1, 1], [], []>} : vector<8x32xbf16>, vector<32x8xbf16>, vector<8x8xf32> -> vector<8x8xf32>
      %24 = arith.index_cast %arg26 : i32 to index
      %c0_14 = arith.constant 0 : index
      %c0_15 = arith.constant 0 : index
      %25 = vector.load %arg10[%24, %c0_14, %c0_15] : memref<4x1x8xf32, #tpu.memory_space<vmem>>, vector<1x1x8xf32>
      %26 = vector.shape_cast %25 : vector<1x1x8xf32> to vector<1x8xf32>
      %27 = vector.broadcast %26 : vector<1x8xf32> to vector<8x8xf32>
      %28 = arith.addf %23, %27 : vector<8x8xf32>
      %29 = arith.truncf %28 : vector<8x8xf32> to vector<8x8xbf16>
      %30 = arith.index_cast %arg26 : i32 to index
      %c0_16 = arith.constant 0 : index
      %c0_17 = arith.constant 0 : index
      %31 = vector.load %arg22[%30, %c0_16, %c0_17] : memref<4x8x8xbf16, #tpu.memory_space<vmem>>, vector<1x8x8xbf16>
      %32 = vector.shape_cast %31 : vector<1x8x8xbf16> to vector<8x8xbf16>
      %cst_18 = arith.constant dense<0.000000e+00> : vector<8x8xf32>
      %33 = tpu.matmul %32, %19, %cst_18 {dimension_numbers = #tpu.dot_dimension_numbers<[1], [1], [0], [0], [0, 0, 1, 0], [], []>} : vector<8x8xbf16>, vector<8x8xbf16>, vector<8x8xf32> -> vector<8x8xf32>
      %34 = arith.index_cast %arg26 : i32 to index
      %c0_19 = arith.constant 0 : index
      %c0_20 = arith.constant 0 : index
      %35 = vector.load %arg23[%34, %c0_19, %c0_20] : memref<4x8x1xf32, #tpu.memory_space<vmem>>, vector<1x8x1xf32>
      %36 = vector.shape_cast %35 : vector<1x8x1xf32> to vector<8x1xf32>
      %cst_21 = arith.constant dense<0xFF800000> : vector<8xf32>
      %37 = vector.multi_reduction <maximumf>, %33, %cst_21 [1] : vector<8x8xf32> to vector<8xf32>
      %38 = vector.shape_cast %37 : vector<8xf32> to vector<8x1xf32>
      %39 = arith.maximumf %36, %38 : vector<8x1xf32>
      %40 = arith.subf %36, %39 : vector<8x1xf32>
      %41 = math.exp %40 : vector<8x1xf32>
      %42 = vector.broadcast %39 : vector<8x1xf32> to vector<8x8xf32>
      %43 = arith.subf %33, %42 : vector<8x8xf32>
      %44 = math.exp %43 : vector<8x8xf32>
      %45 = arith.index_cast %arg26 : i32 to index
      %c0_22 = arith.constant 0 : index
      %c0_23 = arith.constant 0 : index
      %46 = vector.load %arg24[%45, %c0_22, %c0_23] : memref<4x8x1xf32, #tpu.memory_space<vmem>>, vector<1x8x1xf32>
      %47 = vector.shape_cast %46 : vector<1x8x1xf32> to vector<8x1xf32>
      %48 = arith.mulf %41, %47 : vector<8x1xf32>
      %cst_24 = arith.constant dense<0.000000e+00> : vector<8xf32>
      %49 = vector.multi_reduction <add>, %44, %cst_24 [1] : vector<8x8xf32> to vector<8xf32>
      %50 = vector.shape_cast %49 : vector<8xf32> to vector<8x1xf32>
      %51 = arith.addf %48, %50 : vector<8x1xf32>
      %52 = arith.index_cast %arg26 : i32 to index
      %c0_25 = arith.constant 0 : index
      %c0_26 = arith.constant 0 : index
      %53 = vector.load %arg24[%52, %c0_25, %c0_26] : memref<4x8x1xf32, #tpu.memory_space<vmem>>, vector<1x8x1xf32>
      %54 = vector.shape_cast %53 : vector<1x8x1xf32> to vector<8x1xf32>
      %55 = vector.shape_cast %51 : vector<8x1xf32> to vector<1x8x1xf32>
      tpu.vector_store %arg24[%52, %c0_25, %c0_26], %55 {strides = array<i32>} : memref<4x8x1xf32, #tpu.memory_space<vmem>>, vector<1x8x1xf32>,
      %56 = arith.index_cast %arg26 : i32 to index
      %c0_27 = arith.constant 0 : index
      %c0_28 = arith.constant 0 : index
      %57 = vector.load %arg25[%56, %c0_27, %c0_28] : memref<4x8x8xf32, #tpu.memory_space<vmem>>, vector<1x8x8xf32>
      %58 = vector.shape_cast %57 : vector<1x8x8xf32> to vector<8x8xf32>
      %59 = vector.broadcast %41 : vector<8x1xf32> to vector<8x8xf32>
      %60 = arith.mulf %59, %58 : vector<8x8xf32>
      %61 = arith.truncf %44 : vector<8x8xf32> to vector<8x8xbf16>
      %cst_29 = arith.constant dense<0.000000e+00> : vector<8x8xf32>
      %62 = tpu.matmul %61, %29, %cst_29 {dimension_numbers = #tpu.dot_dimension_numbers<[1], [0], [0], [1], [0, 0, 1, 1], [], []>} : vector<8x8xbf16>, vector<8x8xbf16>, vector<8x8xf32> -> vector<8x8xf32>
      %63 = arith.addf %60, %62 : vector<8x8xf32>
      %64 = arith.index_cast %arg26 : i32 to index
      %c0_30 = arith.constant 0 : index
      %c0_31 = arith.constant 0 : index
      %65 = vector.load %arg25[%64, %c0_30, %c0_31] : memref<4x8x8xf32, #tpu.memory_space<vmem>>, vector<1x8x8xf32>
      %66 = vector.shape_cast %65 : vector<1x8x8xf32> to vector<8x8xf32>
      %67 = vector.shape_cast %63 : vector<8x8xf32> to vector<1x8x8xf32>
      tpu.vector_store %arg25[%64, %c0_30, %c0_31], %67 {strides = array<i32>} : memref<4x8x8xf32, #tpu.memory_space<vmem>>, vector<1x8x8xf32>,
      %68 = arith.index_cast %arg26 : i32 to index
      %c0_32 = arith.constant 0 : index
      %c0_33 = arith.constant 0 : index
      %69 = vector.load %arg23[%68, %c0_32, %c0_33] : memref<4x8x1xf32, #tpu.memory_space<vmem>>, vector<1x8x1xf32>
      %70 = vector.shape_cast %69 : vector<1x8x1xf32> to vector<8x1xf32>
      %71 = vector.shape_cast %39 : vector<8x1xf32> to vector<1x8x1xf32>
      tpu.vector_store %arg23[%68, %c0_32, %c0_33], %71 {strides = array<i32>} : memref<4x8x1xf32, #tpu.memory_space<vmem>>, vector<1x8x1xf32>,
    }
    %c4_i32_4 = arith.constant 4 : i32
    %c0_i32_5 = arith.constant 0 : i32
    %7 = arith.cmpi eq, %arg2, %c0_i32_5 : i32
    %8 = arith.extui %7 : i1 to i32
    %c0_i32_6 = arith.constant 0 : i32
    %9 = arith.cmpi ne, %8, %c0_i32_6 : i32
    scf.if %9 {
      %cst = arith.constant 0.000000e+00 : f32
      %10 = vector.broadcast %cst : f32 to vector<8x32xf32>
      %c0_i32_7 = arith.constant 0 : i32
      %c4_i32_8 = arith.constant 4 : i32
      %11 = arith.addi %c0_i32_7, %c4_i32_8 : i32
      %c1_i32_9 = arith.constant 1 : i32
      %12 = scf.for %arg26 = %c0_i32_7 to %11 step %c1_i32_9 iter_args(%arg27 = %10) -> (vector<8x32xf32>)  : i32 {
        %85 = arith.index_cast %arg26 : i32 to index
        %c0_48 = arith.constant 0 : index
        %c0_49 = arith.constant 0 : index
        %86 = vector.load %arg25[%85, %c0_48, %c0_49] : memref<4x8x8xf32, #tpu.memory_space<vmem>>, vector<1x8x8xf32>
        %87 = vector.shape_cast %86 : vector<1x8x8xf32> to vector<8x8xf32>
        %88 = arith.index_cast %arg26 : i32 to index
        %c0_50 = arith.constant 0 : index
        %c0_51 = arith.constant 0 : index
        %89 = vector.load %arg24[%88, %c0_50, %c0_51] : memref<4x8x1xf32, #tpu.memory_space<vmem>>, vector<1x8x1xf32>
        %90 = vector.shape_cast %89 : vector<1x8x1xf32> to vector<8x1xf32>
        %91 = tpu.reciprocal %90 {approx = true} : vector<8x1xf32> -> vector<8x1xf32>
        %92 = vector.broadcast %91 : vector<8x1xf32> to vector<8x8xf32>
        %93 = arith.mulf %87, %92 : vector<8x8xf32>
        %94 = arith.truncf %93 : vector<8x8xf32> to vector<8x8xbf16>
        %95 = arith.index_cast %arg26 : i32 to index
        %c0_52 = arith.constant 0 : index
        %c0_53 = arith.constant 0 : index
        %96 = vector.load %arg11[%95, %c0_52, %c0_53] : memref<4x8x32xbf16, #tpu.memory_space<vmem>>, vector<1x8x32xbf16>
        %97 = vector.shape_cast %96 : vector<1x8x32xbf16> to vector<8x32xbf16>
        %cst_54 = arith.constant dense<0.000000e+00> : vector<8x32xf32>
        %98 = tpu.matmul %94, %97, %cst_54 {dimension_numbers = #tpu.dot_dimension_numbers<[1], [0], [0], [1], [0, 0, 1, 1], [], []>} : vector<8x8xbf16>, vector<8x32xbf16>, vector<8x32xf32> -> vector<8x32xf32>
        %99 = arith.addf %arg27, %98 : vector<8x32xf32>
        scf.yield %99 : vector<8x32xf32>
      }
      %c4_i32_10 = arith.constant 4 : i32
      %c0_11 = arith.constant 0 : index
      %c0_12 = arith.constant 0 : index
      %13 = vector.load %arg12[%c0_11, %c0_12] : memref<1x32xf32, #tpu.memory_space<vmem>>, vector<1x32xf32>
      %14 = vector.broadcast %13 : vector<1x32xf32> to vector<8x32xf32>
      %15 = arith.addf %12, %14 : vector<8x32xf32>
      %c0_13 = arith.constant 0 : index
      %c0_14 = arith.constant 0 : index
      %c0_15 = arith.constant 0 : index
      %16 = vector.load %arg3[%c0_13, %c0_14, %c0_15] : memref<1x8x32xf32, #tpu.memory_space<vmem>>, vector<1x8x32xf32>
      %17 = vector.shape_cast %16 : vector<1x8x32xf32> to vector<8x32xf32>
      %18 = arith.addf %17, %15 : vector<8x32xf32>
      %cst_16 = arith.constant dense<0.000000e+00> : vector<8xf32>
      %19 = vector.multi_reduction <add>, %18, %cst_16 [1] : vector<8x32xf32> to vector<8xf32>
      %20 = vector.shape_cast %19 : vector<8xf32> to vector<8x1xf32>
      %cst_17 = arith.constant 3.200000e+01 : f32
      %21 = vector.broadcast %cst_17 : f32 to vector<8x1xf32>
      %22 = arith.divf %20, %21 : vector<8x1xf32>
      %23 = vector.broadcast %22 : vector<8x1xf32> to vector<8x32xf32>
      %24 = arith.subf %18, %23 : vector<8x32xf32>
      %25 = arith.mulf %24, %24 : vector<8x32xf32>
      %cst_18 = arith.constant dense<0.000000e+00> : vector<8xf32>
      %26 = vector.multi_reduction <add>, %25, %cst_18 [1] : vector<8x32xf32> to vector<8xf32>
      %27 = vector.shape_cast %26 : vector<8xf32> to vector<8x1xf32>
      %cst_19 = arith.constant 3.200000e+01 : f32
      %28 = vector.broadcast %cst_19 : f32 to vector<8x1xf32>
      %29 = arith.divf %27, %28 : vector<8x1xf32>
      %30 = vector.broadcast %22 : vector<8x1xf32> to vector<8x32xf32>
      %31 = arith.subf %18, %30 : vector<8x32xf32>
      %cst_20 = arith.constant 9.99999974E-6 : f32
      %32 = vector.broadcast %cst_20 : f32 to vector<8x1xf32>
      %33 = arith.addf %29, %32 : vector<8x1xf32>
      %34 = math.rsqrt %33 : vector<8x1xf32>
      %35 = vector.broadcast %34 : vector<8x1xf32> to vector<8x32xf32>
      %36 = arith.mulf %31, %35 : vector<8x32xf32>
      %c0_21 = arith.constant 0 : index
      %c0_22 = arith.constant 0 : index
      %37 = vector.load %arg17[%c0_21, %c0_22] : memref<1x32xf32, #tpu.memory_space<vmem>>, vector<1x32xf32>
      %38 = vector.broadcast %37 : vector<1x32xf32> to vector<8x32xf32>
      %39 = arith.mulf %36, %38 : vector<8x32xf32>
      %c0_23 = arith.constant 0 : index
      %c0_24 = arith.constant 0 : index
      %40 = vector.load %arg18[%c0_23, %c0_24] : memref<1x32xf32, #tpu.memory_space<vmem>>, vector<1x32xf32>
      %41 = vector.broadcast %40 : vector<1x32xf32> to vector<8x32xf32>
      %42 = arith.addf %39, %41 : vector<8x32xf32>
      %43 = arith.truncf %42 : vector<8x32xf32> to vector<8x32xbf16>
      %c0_25 = arith.constant 0 : index
      %c0_26 = arith.constant 0 : index
      %44 = vector.load %arg13[%c0_25, %c0_26] : memref<32x64xbf16, #tpu.memory_space<vmem>>, vector<32x64xbf16>
      %cst_27 = arith.constant dense<0.000000e+00> : vector<8x64xf32>
      %45 = tpu.matmul %43, %44, %cst_27 {dimension_numbers = #tpu.dot_dimension_numbers<[1], [0], [0], [1], [0, 0, 1, 1], [], []>} : vector<8x32xbf16>, vector<32x64xbf16>, vector<8x64xf32> -> vector<8x64xf32>
      %c0_28 = arith.constant 0 : index
      %c0_29 = arith.constant 0 : index
      %46 = vector.load %arg14[%c0_28, %c0_29] : memref<1x64xf32, #tpu.memory_space<vmem>>, vector<1x64xf32>
      %47 = vector.broadcast %46 : vector<1x64xf32> to vector<8x64xf32>
      %48 = arith.addf %45, %47 : vector<8x64xf32>
      %cst_30 = arith.constant 0.000000e+00 : f32
      %49 = vector.broadcast %cst_30 : f32 to vector<8x64xf32>
      %50 = arith.maximumf %48, %49 : vector<8x64xf32>
      %51 = arith.truncf %50 : vector<8x64xf32> to vector<8x64xbf16>
      %c0_31 = arith.constant 0 : index
      %c0_32 = arith.constant 0 : index
      %52 = vector.load %arg15[%c0_31, %c0_32] : memref<64x32xbf16, #tpu.memory_space<vmem>>, vector<64x32xbf16>
      %cst_33 = arith.constant dense<0.000000e+00> : vector<8x32xf32>
      %53 = tpu.matmul %51, %52, %cst_33 {dimension_numbers = #tpu.dot_dimension_numbers<[1], [0], [0], [1], [0, 0, 1, 1], [], []>} : vector<8x64xbf16>, vector<64x32xbf16>, vector<8x32xf32> -> vector<8x32xf32>
      %c0_34 = arith.constant 0 : index
      %c0_35 = arith.constant 0 : index
      %54 = vector.load %arg16[%c0_34, %c0_35] : memref<1x32xf32, #tpu.memory_space<vmem>>, vector<1x32xf32>
      %55 = vector.broadcast %54 : vector<1x32xf32> to vector<8x32xf32>
      %56 = arith.addf %53, %55 : vector<8x32xf32>
      %57 = arith.addf %42, %56 : vector<8x32xf32>
      %cst_36 = arith.constant dense<0.000000e+00> : vector<8xf32>
      %58 = vector.multi_reduction <add>, %57, %cst_36 [1] : vector<8x32xf32> to vector<8xf32>
      %59 = vector.shape_cast %58 : vector<8xf32> to vector<8x1xf32>
      %cst_37 = arith.constant 3.200000e+01 : f32
      %60 = vector.broadcast %cst_37 : f32 to vector<8x1xf32>
      %61 = arith.divf %59, %60 : vector<8x1xf32>
      %62 = vector.broadcast %61 : vector<8x1xf32> to vector<8x32xf32>
      %63 = arith.subf %57, %62 : vector<8x32xf32>
      %64 = arith.mulf %63, %63 : vector<8x32xf32>
      %cst_38 = arith.constant dense<0.000000e+00> : vector<8xf32>
      %65 = vector.multi_reduction <add>, %64, %cst_38 [1] : vector<8x32xf32> to vector<8xf32>
      %66 = vector.shape_cast %65 : vector<8xf32> to vector<8x1xf32>
      %cst_39 = arith.constant 3.200000e+01 : f32
      %67 = vector.broadcast %cst_39 : f32 to vector<8x1xf32>
      %68 = arith.divf %66, %67 : vector<8x1xf32>
      %69 = vector.broadcast %61 : vector<8x1xf32> to vector<8x32xf32>
      %70 = arith.subf %57, %69 : vector<8x32xf32>
      %cst_40 = arith.constant 9.99999974E-6 : f32
      %71 = vector.broadcast %cst_40 : f32 to vector<8x1xf32>
      %72 = arith.addf %68, %71 : vector<8x1xf32>
      %73 = math.rsqrt %72 : vector<8x1xf32>
      %74 = vector.broadcast %73 : vector<8x1xf32> to vector<8x32xf32>
      %75 = arith.mulf %70, %74 : vector<8x32xf32>
      %c0_41 = arith.constant 0 : index
      %c0_42 = arith.constant 0 : index
      %76 = vector.load %arg19[%c0_41, %c0_42] : memref<1x32xf32, #tpu.memory_space<vmem>>, vector<1x32xf32>
      %77 = vector.broadcast %76 : vector<1x32xf32> to vector<8x32xf32>
      %78 = arith.mulf %75, %77 : vector<8x32xf32>
      %c0_43 = arith.constant 0 : index
      %c0_44 = arith.constant 0 : index
      %79 = vector.load %arg20[%c0_43, %c0_44] : memref<1x32xf32, #tpu.memory_space<vmem>>, vector<1x32xf32>
      %80 = vector.broadcast %79 : vector<1x32xf32> to vector<8x32xf32>
      %81 = arith.addf %78, %80 : vector<8x32xf32>
      %c0_45 = arith.constant 0 : index
      %c0_46 = arith.constant 0 : index
      %c0_47 = arith.constant 0 : index
      %82 = vector.load %arg21[%c0_45, %c0_46, %c0_47] : memref<1x8x32xf32, #tpu.memory_space<vmem>>, vector<1x8x32xf32>
      %83 = vector.shape_cast %82 : vector<1x8x32xf32> to vector<8x32xf32>
      %84 = vector.shape_cast %81 : vector<8x32xf32> to vector<1x8x32xf32>
      tpu.vector_store %arg21[%c0_45, %c0_46, %c0_47], %84 {strides = array<i32>} : memref<1x8x32xf32, #tpu.memory_space<vmem>>, vector<1x8x32xf32>,
    } else {
    }
    return
  }
  func.func @transform_0(%arg0: i32, %arg1: i32, %arg2: i32) -> (i32, i32, i32) {
    %c0_i32 = arith.constant 0 : i32
    %c0_i32_0 = arith.constant 0 : i32
    return %arg0, %arg1, %c0_i32 : i32, i32, i32
  }
  func.func @transform_1(%arg0: i32, %arg1: i32, %arg2: i32) -> (i32, i32, i32) {
    %c0_i32 = arith.constant 0 : i32
    %c0_i32_0 = arith.constant 0 : i32
    return %arg0, %arg2, %c0_i32 : i32, i32, i32
  }
  func.func @transform_2(%arg0: i32, %arg1: i32, %arg2: i32) -> (i32, i32, i32) {
    %c0_i32 = arith.constant 0 : i32
    %c0_i32_0 = arith.constant 0 : i32
    %c0_i32_1 = arith.constant 0 : i32
    %c0_i32_2 = arith.constant 0 : i32
    return %c0_i32, %c0_i32_0, %c0_i32_1 : i32, i32, i32
  }
  func.func @transform_3(%arg0: i32, %arg1: i32, %arg2: i32) -> (i32, i32, i32) {
    %c0_i32 = arith.constant 0 : i32
    %c0_i32_0 = arith.constant 0 : i32
    %c0_i32_1 = arith.constant 0 : i32
    %c0_i32_2 = arith.constant 0 : i32
    return %c0_i32, %c0_i32_0, %c0_i32_1 : i32, i32, i32
  }
  func.func @transform_4(%arg0: i32, %arg1: i32, %arg2: i32) -> (i32, i32, i32) {
    %c0_i32 = arith.constant 0 : i32
    %c0_i32_0 = arith.constant 0 : i32
    %c0_i32_1 = arith.constant 0 : i32
    %c0_i32_2 = arith.constant 0 : i32
    return %c0_i32, %c0_i32_0, %c0_i32_1 : i32, i32, i32
  }
  func.func @transform_5(%arg0: i32, %arg1: i32, %arg2: i32) -> (i32, i32, i32) {
    %c0_i32 = arith.constant 0 : i32
    %c0_i32_0 = arith.constant 0 : i32
    %c0_i32_1 = arith.constant 0 : i32
    %c0_i32_2 = arith.constant 0 : i32
    return %c0_i32, %c0_i32_0, %c0_i32_1 : i32, i32, i32
  }
  func.func @transform_6(%arg0: i32, %arg1: i32, %arg2: i32) -> (i32, i32, i32) {
    %c0_i32 = arith.constant 0 : i32
    %c0_i32_0 = arith.constant 0 : i32
    %c0_i32_1 = arith.constant 0 : i32
    %c0_i32_2 = arith.constant 0 : i32
    return %c0_i32, %c0_i32_0, %c0_i32_1 : i32, i32, i32
  }
  func.func @transform_7(%arg0: i32, %arg1: i32, %arg2: i32) -> (i32, i32, i32) {
    %c0_i32 = arith.constant 0 : i32
    %c0_i32_0 = arith.constant 0 : i32
    %c0_i32_1 = arith.constant 0 : i32
    %c0_i32_2 = arith.constant 0 : i32
    return %c0_i32, %c0_i32_0, %c0_i32_1 : i32, i32, i32
  }
  func.func @transform_8(%arg0: i32, %arg1: i32, %arg2: i32) -> (i32, i32, i32) {
    %c0_i32 = arith.constant 0 : i32
    %c0_i32_0 = arith.constant 0 : i32
    %c0_i32_1 = arith.constant 0 : i32
    %c0_i32_2 = arith.constant 0 : i32
    return %c0_i32, %c0_i32_0, %c0_i32_1 : i32, i32, i32
  }
  func.func @transform_9(%arg0: i32, %arg1: i32, %arg2: i32) -> (i32, i32) {
    %c0_i32 = arith.constant 0 : i32
    %c0_i32_0 = arith.constant 0 : i32
    %c0_i32_1 = arith.constant 0 : i32
    return %c0_i32, %c0_i32_0 : i32, i32
  }
  func.func @transform_10(%arg0: i32, %arg1: i32, %arg2: i32) -> (i32, i32) {
    %c0_i32 = arith.constant 0 : i32
    %c0_i32_0 = arith.constant 0 : i32
    %c0_i32_1 = arith.constant 0 : i32
    return %c0_i32, %c0_i32_0 : i32, i32
  }
  func.func @transform_11(%arg0: i32, %arg1: i32, %arg2: i32) -> (i32, i32) {
    %c0_i32 = arith.constant 0 : i32
    %c0_i32_0 = arith.constant 0 : i32
    %c0_i32_1 = arith.constant 0 : i32
    return %c0_i32, %c0_i32_0 : i32, i32
  }
  func.func @transform_12(%arg0: i32, %arg1: i32, %arg2: i32) -> (i32, i32) {
    %c0_i32 = arith.constant 0 : i32
    %c0_i32_0 = arith.constant 0 : i32
    %c0_i32_1 = arith.constant 0 : i32
    return %c0_i32, %c0_i32_0 : i32, i32
  }
  func.func @transform_13(%arg0: i32, %arg1: i32, %arg2: i32) -> (i32, i32) {
    %c0_i32 = arith.constant 0 : i32
    %c0_i32_0 = arith.constant 0 : i32
    %c0_i32_1 = arith.constant 0 : i32
    return %c0_i32, %c0_i32_0 : i32, i32
  }
  func.func @transform_14(%arg0: i32, %arg1: i32, %arg2: i32) -> (i32, i32) {
    %c0_i32 = arith.constant 0 : i32
    %c0_i32_0 = arith.constant 0 : i32
    %c0_i32_1 = arith.constant 0 : i32
    return %c0_i32, %c0_i32_0 : i32, i32
  }
  func.func @transform_15(%arg0: i32, %arg1: i32, %arg2: i32) -> (i32, i32) {
    %c0_i32 = arith.constant 0 : i32
    %c0_i32_0 = arith.constant 0 : i32
    %c0_i32_1 = arith.constant 0 : i32
    return %c0_i32, %c0_i32_0 : i32, i32
  }
  func.func @transform_16(%arg0: i32, %arg1: i32, %arg2: i32) -> (i32, i32) {
    %c0_i32 = arith.constant 0 : i32
    %c0_i32_0 = arith.constant 0 : i32
    %c0_i32_1 = arith.constant 0 : i32
    return %c0_i32, %c0_i32_0 : i32, i32
  }
  func.func @transform_17(%arg0: i32, %arg1: i32, %arg2: i32) -> (i32, i32) {
    %c0_i32 = arith.constant 0 : i32
    %c0_i32_0 = arith.constant 0 : i32
    %c0_i32_1 = arith.constant 0 : i32
    return %c0_i32, %c0_i32_0 : i32, i32
  }
  func.func @transform_18(%arg0: i32, %arg1: i32, %arg2: i32) -> (i32, i32, i32) {
    %c0_i32 = arith.constant 0 : i32
    %c0_i32_0 = arith.constant 0 : i32
    return %arg0, %arg1, %c0_i32 : i32, i32, i32
  }
}

</mosaic_0001>

<bundles_post_ra>
// kernel: tpu_custom_call.1
= control target key start
LH: loop header
LB: loop body
LE: loop exit
PB: predicated region body
PF: predicated region fallthrough
CT: control target
= control target key end

     0   :  { %s2229_s0 = inlined_call_operand.vmem [shape: f32[2,8,32], index: 0, kind: input, shape index: {}]   ;;  %s2230_s1 = inlined_call_operand.vmem [shape: f32[2,8,32], index: 1, kind: input, shape index: {}]   ;;  %s2231_s2 = inlined_call_operand.vmem [shape: bf16[4,32,8], index: 2, kind: input, shape index: {}]   ;;  %s2232_s3 = inlined_call_operand.vmem [shape: bf16[4,32,8], index: 3, kind: input, shape index: {}]   ;;  %s2233_s4 = inlined_call_operand.vmem [shape: bf16[4,32,8], index: 4, kind: input, shape index: {}]   ;;  %s2234_s5 = inlined_call_operand.vmem [shape: f32[4,1,8], index: 5, kind: input, shape index: {}]   ;;  %s2235_s6 = inlined_call_operand.vmem [shape: f32[4,1,8], index: 6, kind: input, shape index: {}]   ;;  %s2236_s7 = inlined_call_operand.vmem [shape: f32[4,1,8], index: 7, kind: input, shape index: {}]   ;;  %s2237_s8 = inlined_call_operand.vmem [shape: bf16[4,8,32], index: 8, kind: input, shape index: {}]   ;;  %s2238_s9 = inlined_call_operand.vmem [shape: f32[1,32], index: 9, kind: input, shape index: {}]   ;;  %s2239_s10 = inlined_call_operand.vmem [shape: bf16[32,64], index: 10, kind: input, shape index: {}]   ;;  %s2240_s11 = inlined_call_operand.vmem [shape: f32[1,64], index: 11, kind: input, shape index: {}]   ;;  %s2241_s12 = inlined_call_operand.vmem [shape: bf16[64,32], index: 12, kind: input, shape index: {}]   ;;  %s2242_s13 = inlined_call_operand.vmem [shape: f32[1,32], index: 13, kind: input, shape index: {}]   ;;  %s2243_s14 = inlined_call_operand.vmem [shape: f32[1,32], index: 14, kind: input, shape index: {}]   ;;  %s2244_s15 = inlined_call_operand.vmem [shape: f32[1,32], index: 15, kind: input, shape index: {}]   ;;  %s2245_s16 = inlined_call_operand.vmem [shape: f32[1,32], index: 16, kind: input, shape index: {}]   ;;  %s2246_s17 = inlined_call_operand.vmem [shape: f32[1,32], index: 17, kind: input, shape index: {}]   ;;  %s2247_s18 = inlined_call_operand.hbm [shape: f32[2,8,32], index: 18, kind: output, shape index: {}]  }
   0x1   :  { %2257 = sst [smem:[#allocation16_spill]] %s2229_s0 }
   0x2   :  { %2258 = sst [smem:[#allocation17_spill]] %s2230_s1 }
   0x3   :  { %2259 = sst [smem:[#allocation18_spill]] %s2231_s2 }
   0x4   :  { %2260 = sst [smem:[#allocation19_spill]] %s2247_s18 }
   0x5   :  { %23 = vsyncpa [#allocation7], 0 }
   0x6   :  { %25 = vsyncpa [#allocation7 + $0x1], 0  ;;  %s1945_s27 = smov 0   ;;  %s1947_s28 = smov 0  }
   0x7   :  { %s1949_s29 = smov 0   ;;  %s1951_s30 = smov 0  }
   0x8   :  { %s1953_s0 = smov 0   ;;  %s1955_s19 = smov 0  }
   0x9 LB: > { %2261 = sst [smem:[#allocation9_spill]] %s1800_s27  ;;  %s1463_s1 = sadd.s32 4294967295, %s1820_s19   ;;  %s1820_s19 = sphi %s1955_s19, %s31_s19   ;;  %s1816_s0 = sphi %s1953_s0, %s2283_s0   ;;  %s1812_s30 = sphi %s1951_s30, %s2282_s30   ;;  %s1808_s29 = sphi %s1949_s29, %s2281_s29   ;;  %s1804_s28 = sphi %s1947_s28, %s2285_s28   ;;  %s1800_s27 = sphi %s1945_s27, %s2284_s27  }
   0xa   : > { %2262 = sst [smem:[#allocation10_spill]] %s1808_s29  ;;  %s1464_s20 = sadd.s32 4294967294, %s1820_s19  }
   0xb   : > { %2263 = sst [smem:[#allocation11_spill]] %s1816_s0  ;;  %s50_s21 = sadd.s32 1, %s1816_s0 }
   0xc   : > { %2264 = sst [smem:[#allocation12_spill]] %s1820_s19  ;;  %s451_s22 = sadd.s32 1, %s1808_s29 }
   0xd   : > { %p52_p0 = scmp.ge.s32.totalorder %s50_s21, 2  ;;  %p461_p1 = scmp.ne.s32.totalorder %s1808_s29, %s1804_s28 }
   0xe   : > { %p462_p2 = scmp.eq.s32.totalorder %s1463_s1, 1  ;;  %p467_p3 = scmp.ne.s32.totalorder %s1804_s28, %s1800_s27 }
   0xf   : > { %s2287_s21 = smov (%p52_p0, %s50_s21), 0  ;;  %p468_p5 = scmp.eq.s32.totalorder %s1464_s20, 1 }
  0x10   : > { %2265 = sst [smem:[#allocation13_spill]] %s2287_s21  ;;  %p1985_p4 = por %p462_p2, %p461_p1 }
  0x11   : > { %s446_s23 = ssub.s32 %s1816_s0, %s2287_s21  ;;  %p1467_p6 = scmp.ge.s32.totalorder %s1820_s19, 1 }
  0x12   : > { %p449_p7 = scmp.eq.s32.totalorder %s446_s23, 0  ;;  %p1992_p8 = por %p468_p5, %p467_p3 }
  0x13   : > { %p554_p9 = scmp.lt.s32.totalorder %s1820_s19, 3 }
  0x14   : > { %s2267_s24 = scalar_select %p1992_p8, 1, 0 }
  0x15   : > { %s1998_s25 = scalar_select %p449_p7, %s1808_s29, %s451_s22  }
  0x16   : > { %2268 = sst [smem:[#allocation14_spill]] %s2267_s24  ;;  %p555_p10 = pnand %p1467_p6, %p554_p9 }
  0x17   : > { %2269 = sst [smem:[#allocation15_spill]] %s1998_s25  ;;  %s2248_s26 = sand.u32 (!%p555_p10), 1, %s1804_s28   ;;  %vm638_vm0 = vcmask (!%p555_p10), 7168   ;;  %vm647_vm1 = vcmask (!%p555_p10), 64512   ;;  %v1838_v0 = vmov (!%p555_p10), -inf   ;;  %v1839_v1 = vmov (!%p555_p10), 0.0  }
  0x18   : > { %558 = sbr.rel (%p555_p10) target bundleno = 2660 (0xa64), region = 92  ;;  %p617_p11 = scmp.lt.s32.totalorder (!%p555_p10), %s1812_s30, 1  ;;  %639 = vst.msk [vmem:[#allocation3] sm:$0xff] (!%p555_p10), %vm638_vm0, %v1838_v0  ;;  %640 = vst.msk [vmem:[#allocation3 + $0x8] sm:$0xff] (!%p555_p10), %vm638_vm0, %v1838_v0 }
  0x19   : > { %s2004_s1 = sshll.u32 (!%p555_p10), %s2248_s26, 3  ;;  %641 = vst.msk [vmem:[#allocation3 + $0x10] sm:$0xff] (!%p555_p10), %vm638_vm0, %v1838_v0  ;;  %642 = vst.msk [vmem:[#allocation3 + $0x18] sm:$0xff] (!%p555_p10), %vm638_vm0, %v1838_v0  ;;  %s2270_s21 = sld [smem:[#allocation16_spill]] (!%p555_p10) }
  0x1a   : > { %643 = vst.msk [vmem:[#allocation4] sm:$0xff] (!%p555_p10), %vm638_vm0, %v1839_v1  ;;  %644 = vst.msk [vmem:[#allocation4 + $0x8] sm:$0xff] (!%p555_p10), %vm638_vm0, %v1839_v1  ;;  %s2271_s24 = sld [smem:[#allocation17_spill]] (!%p555_p10)  ;;  %s2041_s18 = smov (!%p555_p10), 0  }
  0x1b   : > { %645 = vst.msk [vmem:[#allocation4 + $0x10] sm:$0xff] (!%p555_p10), %vm638_vm0, %v1839_v1  ;;  %646 = vst.msk [vmem:[#allocation4 + $0x18] sm:$0xff] (!%p555_p10), %vm638_vm0, %v1839_v1 }
  0x1c   : > { %648 = vst.msk [vmem:[#allocation5] sm:$0xff] (!%p555_p10), %vm647_vm1, %v1839_v1  ;;  %649 = vst.msk [vmem:[#allocation5 + $0x8] sm:$0xff] (!%p555_p10), %vm647_vm1, %v1839_v1 }
  0x1d   : > { %650 = vst.msk [vmem:[#allocation5 + $0x10] sm:$0xff] (!%p555_p10), %vm647_vm1, %v1839_v1  ;;  %651 = vst.msk [vmem:[#allocation5 + $0x18] sm:$0xff] (!%p555_p10), %vm647_vm1, %v1839_v1 }
  0x1f   : > { %s618_s20 = scalar_select %p617_p11, %s1812_s30, 1 }
  0x21   : > { %s1469_s22 = sshll.u32 %s618_s20, 3 }
  0x22   : > { %s2032_s0 = scalar_lea.vmem %s2270_s21, %s1469_s22  ;;  %s2037_s27 = scalar_lea.vmem %s2271_s24, %s1469_s22 }
  0x23   : > { %v636_v2 = vld [vmem:[%s2032_s0] sm:$0xff] }
  0x24   : > { %v637_v3 = vpack.c.bf16 %v636_v2, %v636_v2 }
  0x25 LB: >> { %v1840_v4 = vmov 0.0   ;;  %vm1841_vm2 = vmmov 0   ;;  %s1515_s21 = sshll.u32 %s1824_s18, 4  ;;  %s2272_s29 = sld [smem:[#allocation18_spill]]  ;;  %vm685_vm3 = vcmask 261120   ;;  %vm732_vm4 = vcmask 60416   ;;  %s1824_s18 = sphi %s2041_s18, %s657_s18  }
  0x26   : >> { %1541 = vmatprep.subr.bf16.mxu0 %v1840_v4  ;;  %1545 = vmatprep.mubr.msk.bf16.mxu0 %vm1841_vm2, %v1840_v4  ;;  %s665_s23 = scalar_lea.vmem %s2234_s5, %s1824_s18  ;;  %s1477_s19 = sshll.u32 %s1824_s18, 2 }
  0x27   : >> { %v1473_v7 = vld [vmem:[%s665_s23] ss:$0 sm:$0xff]  ;;  %s657_s18 = sadd.s32 1, %s1824_s18  }
  0x28   : >> { %p654_p12 = scmp.ge.s32.totalorder %s657_s18, 4  }
  0x29   : > { %v734_v14 = vld [vmem:[%s2037_s27] sm:$0xff] (%p654_p12)  ;;  %s2056_s26 = smov (%p654_p12), 0  }
  0x2a   : > { %v2054_v15 = vpack.c.bf16 (%p654_p12), %v734_v14, %v734_v14 }
  0x2b   : >> { %s660_s25 = scalar_lea.vmem %s2272_s29, %s1515_s21  ;;  %s731_s21 = scalar_lea.vmem [#allocation2], %s1477_s19 }
  0x2c   : >> { %v1701_v5 = vld [vmem:[%s660_s25] sm:$0xff]   ;;  %v1702_v6 = vld [vmem:[%s660_s25 + $0x8] sm:$0xff]  }
  0x2d   : >> { %1542 = vmatpush3.bf16.msra.mxu0 %v1701_v5 }
  0x2e   : >> { %1543 = vmatprep.subr.bf16.mxu0 %v1840_v4 }
  0x31   : >> { %1544 = vmatpush3.bf16.msra.mxu0 %v1702_v6 }
  0x34   : >> { %1546 = vmatmul.mubr.msk.bf16.vlgmr.msra.gmra.mrb[0].mxu0 %vm685_vm3, %v637_v3 }
 0x106   : > { %656 = sbr.rel (!%p654_p12) target bundleno = 37 (0x25), region = 173 }
 0x107   : >> { %v723_v8 = vpop.f32.mrb[0].mxu0 }
 0x108   : >> { %v724_v9 = vadd.f32 %v1473_v7, %v723_v8  ;;  %v1547_v10 = vpop.f32.mrb[1].mxu0 }
 0x109   : >> { %v726_v11 = vpop.f32.mrb[2].mxu0 }
 0x10a   : >> { %v729_v12 = vpack.c.bf16 %v724_v9, %v724_v9  ;;  %v1548_v13 = vpop.f32.mrb[3].mxu0 }
 0x10c   : >> { %733 = vst.msk [vmem:[%s731_s21] sm:$0xf] %vm732_vm4, %v729_v12 }
 0x10d LB: >> { %v1842_v16 = vmov 0.0   ;;  %vm1843_vm5 = vmmov 0   ;;  %s1516_s18 = sshll.u32 %s1828_s26, 4  ;;  %s749_s24 = scalar_lea.vmem %s2235_s6, %s1828_s26  ;;  %v1844_v35 = vmov 0   ;;  %vm970_vm6 = vcmask 1043456   ;;  %s1828_s26 = sphi %s2056_s26, %s741_s26  }
 0x10e   : >> { %1549 = vmatprep.subr.bf16.mxu0 %v1842_v16  ;;  %1553 = vmatprep.mubr.msk.bf16.mxu0 %vm1843_vm5, %v1842_v16  ;;  %s744_s20 = scalar_lea.vmem %s2232_s3, %s1516_s18  ;;  %v1480_v19 = vld [vmem:[%s749_s24] ss:$0 sm:$0xff]  ;;  %s1489_s22 = sshll.u32 %s1828_s26, 2 }
 0x10f   : >> { %1557 = vmatprep.subr.bf16.mxu1 %v1842_v16  ;;  %1561 = vmatprep.mubr.msk.bf16.mxu1 %vm1843_vm5, %v1842_v16  ;;  %v1705_v17 = vld [vmem:[%s744_s20] sm:$0xff]   ;;  %v1706_v18 = vld [vmem:[%s744_s20 + $0x8] sm:$0xff]   ;;  %s882_s23 = scalar_lea.vmem [#allocation2], %s1489_s22  ;;  %s815_s19 = scalar_lea.vmem %s2233_s4, %s1516_s18 }
 0x110   : >> { %1550 = vmatpush3.bf16.msra.mxu0 %v1705_v17  ;;  %v1707_v28 = vld [vmem:[%s815_s19] sm:$0xff]   ;;  %v1708_v29 = vld [vmem:[%s815_s19 + $0x8] sm:$0xff]   ;;  %1703 = vset.pattern.permute.xlu0 %v1844_v35  ;;  %s2085_s18 = sshll.u32 %s1828_s26, 3  ;;  %s820_s24 = scalar_lea.vmem %s2236_s7, %s1828_s26 }
 0x111   : >> { %1551 = vmatprep.subr.bf16.mxu0 %v1842_v16  ;;  %1558 = vmatpush3.bf16.msra.mxu1 %v1707_v28  ;;  %s932_s20 = scalar_lea.vmem [#allocation3], %s2085_s18  ;;  %v1485_v41 = vld [vmem:[%s820_s24] ss:$0 sm:$0xff]  ;;  %s949_s22 = scalar_lea.vmem [#allocation4], %s2085_s18 }
 0x112   : >> { %1559 = vmatprep.subr.bf16.mxu1 %v1842_v16  ;;  %1704 = vset.pattern.permute.xlu1 %v1844_v35  ;;  %v933_v36 = vld [vmem:[%s932_s20] sm:$0xff]  ;;  %s741_s26 = sadd.s32 1, %s1828_s26  }
 0x113   : >> { %v883_v27 = vld [vmem:[%s882_s23] sm:$0xf]  ;;  %s958_s23 = scalar_lea.vmem [#allocation5], %s2085_s18  ;;  %p738_p13 = scmp.ge.s32.totalorder %s741_s26, 4  }
 0x114   : >> { %1552 = vmatpush3.bf16.msra.mxu0 %v1706_v18  ;;  %v950_v56 = vld [vmem:[%s949_s22] sm:$0xff]  ;;  %v1830_v5 = vmov (%p738_p13), 0.0   ;;  %s2103_s21 = smov (%p738_p13), 0  }
 0x115   : >> { %1565 = vmatprep.subr.bf16.mxu0 %v1842_v16  ;;  %1560 = vmatpush3.bf16.msra.mxu1 %v1708_v29  ;;  %v959_v60 = vld [vmem:[%s958_s23] sm:$0xff] }
 0x116   : >> { %1571 = vmatprep.subr.bf16.mxu1 %v1842_v16 }
 0x117   : >> { %1554 = vmatmul.mubr.msk.bf16.vlgmr.msra.gmra.mrb[0].mxu0 %vm685_vm3, %v2054_v15 }
 0x118   : >> { %1567 = vmatprep.mubr.msk.bf16.mxu0 %vm1843_vm5, %v1842_v16  ;;  %1562 = vmatmul.mubr.msk.bf16.vlgmr.msra.gmra.mrb[0].mxu1 %vm685_vm3, %v2054_v15 }
 0x119   : >> { %1573 = vmatprep.mubr.msk.bf16.mxu1 %vm1843_vm5, %v1842_v16 }
 0x1ea   : >> { %v807_v20 = vpop.f32.mrb[0].mxu0 }
 0x1eb   : >> { %v808_v21 = vadd.f32 %v1480_v19, %v807_v20  ;;  %v1555_v22 = vpop.f32.mrb[1].mxu0  ;;  %v874_v40 = vpop.f32.mrb[0].mxu1 }
 0x1ec   : >> { %v810_v23 = vpop.f32.mrb[2].mxu0  ;;  %v1563_v42 = vpop.f32.mrb[1].mxu1  ;;  %v875_v43 = vadd.f32 %v1485_v41, %v874_v40 }
 0x1ed   : >> { %v813_v24 = vpack.c.bf16 %v808_v21, %v808_v21  ;;  %v1556_v25 = vpop.f32.mrb[3].mxu0  ;;  %v877_v44 = vpop.f32.mrb[2].mxu1 }
 0x1ee   : >> { %v1564_v45 = vpop.f32.mrb[3].mxu1  ;;  %v880_v46 = vpack.c.bf16 %v875_v43, %v875_v43 }
 0x1ef   : >> { %v889_v26 = vsel %vm647_vm1, %v813_v24, 0 }
 0x1f0   : >> { %1566 = vmatpush3.bf16.xpose.msra.mxu0 %v889_v26  ;;  %v972_v47 = vsel %vm970_vm6, %v880_v46, 0 }
 0x1f1   : >> { %1572 = vmatpush3.bf16.msra.mxu1 %v972_v47 }
 0x1f7   : >> { %1568 = vmatmul.mubr.msk.bf16.vlgmr.msra.gmra.mrb[4].mxu0 %vm647_vm1, %v883_v27 }
 0x2ca   : >> { %v925_v30 = vpop.f32.mrb[4].mxu0 }
 0x2cb   : >> { %v1569_v31 = vpop.f32.mrb[5].mxu0  ;;  %v934_v32 = vsel %vm647_vm1, %v925_v30, -inf }
 0x2cc   : >> { %935 = vmax.xlane.f32.xlu0 %v934_v32  ;;  %v928_v33 = vpop.f32.mrb[6].mxu0 }
 0x2cd   : >> { %v1570_v34 = vpop.f32.mrb[7].mxu0 }
 0x359   : >> { %v936_v37 = vpop.xlane.xlu0 %935 }
 0x35a   : >> { %v937_v38 = vmax.f32 %v933_v36, %v936_v37 }
 0x35c   : >> { %v938_v39 = vsub.f32 %v933_v36, %v937_v38  ;;  %1016 = vst.msk [vmem:[%s932_s20] sm:$0xff] %vm638_vm0, %v937_v38  ;;  %943 = vperm.xlu0 %1703, %v937_v38  }
 0x35e   : >> { %v939_v54 = vmul.f32 1.442695, %v938_v39 }
 0x3db   : >> { %v944_v48 = vpop.permute.xlu0 %943 }
 0x3dc   : >> { %v946_v49 = vsub.f32 %v925_v30, %v944_v48 }
 0x3de   : >> { %v947_v50 = vmul.f32 1.442695, %v946_v49 }
 0x3e0   : >> { %1709 = vpow2.f32 %v947_v50 }
 0x3e1   : >> { %1711 = vpow2.f32 %v939_v54 }
 0x3ea   : >> { %v1710_v51 = vpop.eup %1709 }
 0x3eb   : >> { %v952_v52 = vsel %vm647_vm1, %v1710_v51, 0.0  ;;  %v966_v53 = vpack.c.bf16 %v1710_v51, %v1710_v51  ;;  %v1712_v55 = vpop.eup %1711 }
 0x3ec   : >> { %953 = vadd.xlane.f32.xlu1 %v952_v52  ;;  %v951_v57 = vmul.f32 %v1712_v55, %v950_v56 }
 0x3ed   : >> { %1574 = vmatmul.mubr.msk.bf16.vlgmr.msra.gmra.mrb[4].mxu1 %vm647_vm1, %v966_v53 }
 0x3fd   : >> { %962 = vperm.xlu1 %1704, %v1712_v55  }
 0x479   : >> { %v954_v58 = vpop.xlane.xlu1 %953 }
 0x47a   : >> { %v955_v59 = vadd.f32 %v954_v58, %v951_v57 }
 0x47c   : >> { %957 = vst.msk [vmem:[%s949_s22] sm:$0xff] %vm638_vm0, %v955_v59 }
 0x47d   : >> { %v963_v61 = vpop.permute.xlu1 %962 }
 0x47e   : >> { %v965_v62 = vmul.f32 %v963_v61, %v959_v60 }
 0x4bd   : > { %740 = sbr.rel (!%p738_p13) target bundleno = 269 (0x10d), region = 184 }
 0x4c0   : >> { %v1008_v63 = vpop.f32.mrb[4].mxu1 }
 0x4c1   : >> { %v1014_v0 = vadd.f32 %v1008_v63, %v965_v62  ;;  %v1575_v2 = vpop.f32.mrb[5].mxu1 }
 0x4c2   : >> { %v1011_v3 = vpop.f32.mrb[6].mxu1 }
 0x4c3   : >> { %1015 = vst.msk [vmem:[%s958_s23] sm:$0xff] %vm647_vm1, %v1014_v0  ;;  %v1576_v4 = vpop.f32.mrb[7].mxu1 }
 0x4c4 LB: >> { %v1845_v6 = vmov 0   ;;  %s1493_s27 = sshll.u32 %s1836_s21, 3  ;;  %s1494_s18 = sshll.u32 %s1836_s21, 2  ;;  %v1846_v10 = vmov 0.0   ;;  %vm1847_vm7 = vmmov 0   ;;  %s1836_s21 = sphi %s2103_s21, %s1025_s21   ;;  %v1832_v5 = vphi %v1830_v5, %v1831_v5  }
 0x4c5   : >> { %1713 = vset.pattern.permute.xlu0 %v1845_v6  ;;  %s1030_s19 = scalar_lea.vmem [#allocation4], %s1493_s27  ;;  %s1041_s29 = scalar_lea.vmem %s2237_s8, %s1494_s18  ;;  %1577 = vmatprep.subr.bf16.mxu0 %v1846_v10 }
 0x4c6   : >> { %v1031_v7 = vld [vmem:[%s1030_s19] sm:$0xff]  ;;  %1579 = vmatprep.mubr.msk.bf16.mxu0 %vm1847_vm7, %v1846_v10  ;;  %s1028_s25 = scalar_lea.vmem [#allocation5], %s1493_s27  ;;  %s1025_s21 = sadd.s32 1, %s1836_s21  }
 0x4c7   : >> { %1714 = vrcp.f32 %v1031_v7  ;;  %v1042_v9 = vld [vmem:[%s1041_s29] sm:$0xf]  ;;  %p1022_p0 = scmp.ge.s32.totalorder %s1025_s21, 4  }
 0x4c8   : >> { %v1049_v11 = vsel %vm970_vm6, %v1042_v9, 0  ;;  %v1496_v21 = vld [vmem:[%s2238_s9] ss:$0 sm:$0xff] (%p1022_p0)  ;;  %1591 = vmatprep.subr.bf16.mxu1 (%p1022_p0), %v1839_v1  ;;  %vm1848_vm8 = vmmov (%p1022_p0), 0   ;;  %v1717_v32 = vld [vmem:[%s2239_s10 + $0x8] sm:$0xff] (%p1022_p0)   ;;  %v1720_v45 = vld [vmem:[%s2241_s12 + $0x10] sm:$0xff] (%p1022_p0)  }
 0x4c9   : >> { %1578 = vmatpush3.bf16.msra.mxu0 %v1049_v11  ;;  %v1100_v22 = vld [vmem:[%s2032_s0] sm:$0xff] (%p1022_p0)  ;;  %1599 = vmatprep.mubr.msk.bf16.mxu1 (%p1022_p0), %vm1848_vm8, %v1839_v1  ;;  %v1719_v34 = vld [vmem:[%s2241_s12 + $0x8] sm:$0xff] (%p1022_p0)   ;;  %v1721_v46 = vld [vmem:[%s2241_s12 + $0x18] sm:$0xff] (%p1022_p0)   ;;  %vm1241_vm9 = vcmask (%p1022_p0), 523264   ;;  %s1512_s23 = sshll.u32 (%p1022_p0), %s1812_s30, 7  ;;  %s2273_s21 = scalar_lea.vmem (%p1022_p0), [#allocation6], %s2004_s1 }
 0x4ca   : >> { %v1029_v12 = vld [vmem:[%s1028_s25] sm:$0xff]  ;;  %1583 = vmatprep.subr.bf16.mxu0 (%p1022_p0), %v1839_v1  ;;  %s1331_s0 = sshll.u32 (%p1022_p0), %s2273_s21, 4  ;;  %s2274_s18 = sld [smem:[#allocation19_spill]] (%p1022_p0)  ;;  %s2179_s0 = int_to_ptr.vmem [resolvable:$true] %s1331_s0 }
 0x4cb   : > { %v1716_v31 = vld [vmem:[%s2239_s10] sm:$0xff] (%p1022_p0)   ;;  %s2275_s20 = smov (%p1022_p0), %s2273_s21  ;;  %s2276_s29 = sand.u32 (%p1022_p0), 1, %s1804_s28  }
 0x4cc   : > { %v1718_v33 = vld [vmem:[%s2241_s12] sm:$0xff] (%p1022_p0)   ;;  %s1317_s25 = scalar_lea.sflag (%p1022_p0), [#allocation7], %s2276_s29  ;;  %s1726_s30 = scalar_lea.vmem (%p1022_p0), %s2179_s0, 128 }
 0x4cd   : > { %1592 = vmatpush3.bf16.msra.mxu1 (%p1022_p0), %v1718_v33  ;;  %v1497_v39 = vld [vmem:[%s2243_s14] ss:$0 sm:$0xff] (%p1022_p0)  ;;  %p1727_p1 = scmp.ne.s32.totalorder (%p1022_p0), %s2179_s0, %s1726_s30  ;;  %s1849_s24 = smov (%p1022_p0), [#allocation6]  }
 0x4ce   : > { %1593 = vmatprep.subr.bf16.mxu1 (%p1022_p0), %v1839_v1  ;;  %v1498_v41 = vld [vmem:[%s2244_s15] ss:$0 sm:$0xff] (%p1022_p0)  ;;  %s1730_s22 = sshll.u32 (%p1022_p0), %s1849_s24, 4  ;;  %s1731_s22 = int_to_ptr.vmem [resolvable:$false] %s1730_s22 }
 0x4cf   : > { %v1499_v47 = vld [vmem:[%s2240_s11] ss:$0 sm:$0xff] (%p1022_p0)  ;;  %p1728_p2 = pnand (%p1022_p0), %p1727_p1, %p1985_p4  ;;  %p1733_p5 = scmp.lt.s32.totalorder (%p1022_p0), %s2179_s0, %s1731_s22 }
 0x4d0   : > { %v1510_v10 = vld [vmem:[%s2246_s17] ss:$0 sm:$0xff] (%p1022_p0)  ;;  %s2177_s26 = scalar_lea.hbm (%p1022_p0), %s2274_s18, %s1512_s23  ;;  %s1732_s23 = scalar_lea.vmem (%p1022_p0), %s1731_s22, 256 }
 0x4d1   : >> { %v1715_v8 = vpop.eup %1714  ;;  %1594 = vmatpush3.bf16.msra.mxu1 (%p1022_p0), %v1719_v34  ;;  %p1729_p3 = pneg (%p1022_p0), %p1728_p2  ;;  %p1734_p6 = scmp.lt.s32.totalorder (%p1022_p0), %s1732_s23, %s1726_s30 }
 0x4d2   : >> { %1035 = vperm.xlu0 %1713, %v1715_v8   ;;  %1595 = vmatprep.subr.bf16.mxu1 (%p1022_p0), %v1839_v1  ;;  %v1509_v8 = vld [vmem:[%s2245_s16] ss:$0 sm:$0xff] (%p1022_p0) }
 0x4d3   : > { %p1735_p7 = por (%p1022_p0), %p1734_p6, %p1733_p5 }
 0x4d5   : > { %1596 = vmatpush3.bf16.msra.mxu1 (%p1022_p0), %v1720_v45  ;;  %p1736_p9 = pnand (%p1022_p0), %p1735_p7, %p1729_p3 }
 0x4d6   : > { %1597 = vmatprep.subr.bf16.mxu1 (%p1022_p0), %v1839_v1 }
 0x4d9   : > { %1598 = vmatpush3.bf16.msra.mxu1 (%p1022_p0), %v1721_v46 }
 0x551   : >> { %v1036_v13 = vpop.permute.xlu0 %1035 }
 0x552   : >> { %v1038_v14 = vmul.f32 %v1036_v13, %v1029_v12 }
 0x554   : >> { %v1039_v15 = vpack.c.bf16 %v1038_v14, %v1038_v14 }
 0x556   : >> { %1580 = vmatmul.mubr.msk.bf16.vlgmr.msra.gmra.mrb[0].mxu0 %vm647_vm1, %v1039_v15 }
 0x557   : > { %1587 = vmatprep.mubr.msk.bf16.mxu0 (%p1022_p0), %vm1848_vm8, %v1839_v1  ;;  %1584 = vmatpush3.bf16.msra.mxu0 (%p1022_p0), %v1716_v31 }
 0x558   : > { %1585 = vmatprep.subr.bf16.mxu0 (%p1022_p0), %v1839_v1  ;;  %v1503_v1 = vld [vmem:[%s2242_s13] ss:$0 sm:$0xff] (%p1022_p0) }
 0x55b   : > { %1586 = vmatpush3.bf16.msra.mxu0 (%p1022_p0), %v1717_v32 }
 0x626   : > { %1024 = sbr.rel (!%p1022_p0) target bundleno = 1220 (0x4c4), region = 195 }
 0x629   : >> { %v1085_v16 = vpop.f32.mrb[0].mxu0 }
 0x62a   : >> { %v1091_v17 = vadd.f32 %v1832_v5, %v1085_v16   ;;  %v1581_v18 = vpop.f32.mrb[1].mxu0 }
 0x62b   : >> { %v1088_v19 = vpop.f32.mrb[2].mxu0 }
 0x62c   : >> { %v1582_v20 = vpop.f32.mrb[3].mxu0  ;;  %v1831_v5 = vmov %v1091_v17   ;;  %v1099_v23 = vadd.f32 (%p1022_p0), %v1496_v21, %v1091_v17 }
 0x62e   : > { %v1101_v24 = vadd.f32 %v1100_v22, %v1099_v23 }
 0x630   : > { %v1103_v25 = vsel %vm685_vm3, %v1101_v24, 0.0 }
 0x631   : > { %1104 = vadd.xlane.f32.xlu0 %v1103_v25 }
 0x6be   : > { %v1105_v26 = vpop.xlane.xlu0 %1104 }
 0x6bf   : > { %v1107_v27 = vmul.f32 0.03125, %v1105_v26 }
 0x6c1   : > { %v1108_v28 = vsub.f32 %v1101_v24, %v1107_v27 }
 0x6c3   : > { %v1109_v29 = vmul.f32 %v1108_v28, %v1108_v28 }
 0x6c5   : > { %v1110_v30 = vsel %vm685_vm3, %v1109_v29, 0.0 }
 0x6c6   : > { %1111 = vadd.xlane.f32.xlu0 %v1110_v30 }
 0x753   : > { %v1112_v35 = vpop.xlane.xlu0 %1111 }
 0x754   : > { %v1113_v36 = vmul.f32 0.03125, %v1112_v35 }
 0x756   : > { %v1114_v37 = vadd.f32 1e-05, %v1113_v36 }
 0x758   : > { %1722 = vrsqrt.f32 %v1114_v37 }
 0x762   : > { %v1723_v38 = vpop.eup %1722 }
 0x763   : > { %v1116_v40 = vmul.f32 %v1723_v38, %v1108_v28 }
 0x765   : > { %v1124_v42 = vmul.f32 %v1497_v39, %v1116_v40 }
 0x767   : > { %v1132_v43 = vadd.f32 %v1498_v41, %v1124_v42 }
 0x769   : > { %v1133_v44 = vpack.c.bf16 %v1132_v43, %v1132_v43 }
 0x76b   : > { %1588 = vmatmul.mubr.msk.bf16.vlgmr.msra.gmra.mrb[0].mxu0 %vm685_vm3, %v1133_v44 }
 0x83e   : > { %v1194_v48 = vpop.f32.mrb[0].mxu0 }
 0x83f   : > { %v1195_v49 = vadd.f32 %v1499_v47, %v1194_v48  ;;  %v1589_v50 = vpop.f32.mrb[1].mxu0 }
 0x840   : > { %v1197_v51 = vpop.f32.mrb[2].mxu0 }
 0x841   : > { %v1200_v52 = vmax.f32 %v1195_v49, 0.0  ;;  %v1590_v53 = vpop.f32.mrb[3].mxu0 }
 0x843   : > { %v1201_v54 = vpack.c.bf16 %v1200_v52, %v1200_v52 }
 0x845   : > { %1600 = vmatmul.mubr.msk.bf16.vlgmr.msra.gmra.mrb[0].mxu1 %vm1241_vm9, %v1201_v54 }
 0x918   : > { %v1279_v55 = vpop.f32.mrb[0].mxu1 }
 0x919   : > { %v1280_v56 = vadd.f32 %v1503_v1, %v1279_v55  ;;  %v1601_v57 = vpop.f32.mrb[1].mxu1 }
 0x91a   : > { %v1282_v58 = vpop.f32.mrb[2].mxu1 }
 0x91b   : > { %v1602_v59 = vpop.f32.mrb[3].mxu1  ;;  %v1285_v60 = vadd.f32 %v1280_v56, %v1132_v43 }
 0x91d   : > { %v1286_v61 = vsel %vm685_vm3, %v1285_v60, 0.0 }
 0x91e   : > { %1287 = vadd.xlane.f32.xlu1 %v1286_v61 }
 0x9ab   : > { %v1288_v62 = vpop.xlane.xlu1 %1287 }
 0x9ac   : > { %v1289_v63 = vmul.f32 0.03125, %v1288_v62 }
 0x9ae   : > { %v1290_v0 = vsub.f32 %v1285_v60, %v1289_v63 }
 0x9b0   : > { %v1291_v2 = vmul.f32 %v1290_v0, %v1290_v0 }
 0x9b2   : > { %v1292_v3 = vsel %vm685_vm3, %v1291_v2, 0.0 }
 0x9b3   : > { %1293 = vadd.xlane.f32.xlu1 %v1292_v3 }
 0xa40   : > { %v1294_v4 = vpop.xlane.xlu1 %1293 }
 0xa41   : > { %v1295_v5 = vmul.f32 0.03125, %v1294_v4 }
 0xa43   : > { %v1296_v6 = vadd.f32 1e-05, %v1295_v5 }
 0xa45   : > { %1724 = vrsqrt.f32 %v1296_v6 }
 0xa4f   : > { %v1725_v7 = vpop.eup %1724 }
 0xa50   : > { %v1298_v9 = vmul.f32 %v1725_v7, %v1290_v0 }
 0xa52   : > { %v1306_v11 = vmul.f32 %v1509_v8, %v1298_v9 }
 0xa54   : > { %v1314_v12 = vadd.f32 %v1510_v10, %v1306_v11 }
 0xa56   : > { %1315 = vst.msk [vmem:[%s2275_s20] sm:$0xff] %vm685_vm3, %v1314_v12 }
 0xa57   : > { %1739 = shalt.err (!%p1736_p9)
}
 0xa58   : > { %s1740_s1 = scalar_lea.hbm %s2177_s26, 128  ;;  %s1744_s19 = scalar_lea.hbm %s2274_s18, 256 }
 0xa59   : > { %p1741_p10 = scmp.ne.s32.totalorder %s2177_s26, %s1740_s1  ;;  %p1745_p13 = scmp.lt.u32.totalorder %s2177_s26, %s2274_s18 }
 0xa5a   : > { %p1746_p0 = scmp.lt.u32.totalorder %s1744_s19, %s1740_s1  ;;  %p1748_p2 = scmp.lt.u32.totalorder %s1740_s1, %s2177_s26 }
 0xa5b   : > { %p1742_p11 = pnand %p1741_p10, %p1985_p4 }
 0xa5c   : > { %p1747_p1 = por %p1746_p0, %p1745_p13 }
 0xa5d   : > { %p1743_p12 = pneg %p1742_p11 }
 0xa5e   : > { %p1749_p3 = por %p1748_p2, %p1747_p1 }
 0xa60   : > { %p1750_p5 = pnand %p1749_p3, %p1743_p12 }
 0xa62   : > { %1753 = shalt.err (!%p1750_p5)
}
 0xa63   : > { %1603 = dma.vmem_to_hbm [thread:$0]  (%p1985_p4), %s2179_s0, 128, %s2177_s26, %s1317_s25  }
 0xa64 PF: > { %s2277_s30 = sld [smem:[#allocation12_spill]]  ;;  %s2278_s24 = sld [smem:[#allocation9_spill]] }
 0xa6a   : > { %p1609_p6 = scmp.ge.s32.totalorder %s2277_s30, 2  ;;  %s1343_s23 = sand.u32 1, %s2278_s24  }
 0xa6b   : > { %s1344_s21 = scalar_lea.sflag [#allocation7], %s1343_s23 }
 0xa6c   : > { %p1606_p7 = pnand %p1609_p6, %p1992_p8 }
 0xa6e   : > { %1795 = dma.done.wait (!%p1606_p7), %s1344_s21, 128  }
 0xa6f   : > { %1797 = vsyncadd (!%p1606_p7), %s1344_s21, 4294967168  ;;  %s31_s19 = sadd.s32 1, %s2277_s30   ;;  %s2280_s1 = sld [smem:[#allocation10_spill]] }
 0xa70   : > { %p28_p9 = scmp.ge.s32.totalorder %s31_s19, 4   ;;  %s2281_s29 = sld [smem:[#allocation15_spill]] }
 0xa71   : > { %s2282_s30 = sld [smem:[#allocation11_spill]]  ;;  %s2283_s0 = sld [smem:[#allocation13_spill]] }
 0xa72   : > { %s2284_s27 = smov %s1804_s28  ;;  %30 = sbr.rel (!%p28_p9) target bundleno = 9 (0x9), region = 206 }
 0xa75   : > { %s2285_s28 = smov %s2280_s1 }
 0xa79   :  { %1349 = vsyncpa [#allocation7], 1 }
 0xa7a   :  { %1351 = vsyncpa [#allocation7 + $0x1], 1 }

</bundles_post_ra>
